<compile_context>
chip_gen: v7x
topology: tpu7x:2x2x1
jax: 0.10.0
libtpu: 0.0.40
codegen_flags: <defaults>
</compile_context>

<pallas_src>
import jax
import jax.numpy as jnp
from jax import lax
from jax.experimental import pallas as pl
from jax.experimental.pallas import tpu as pltpu


def _cwsa_kernel(x_ref, w_ref, b_ref, corr_ref, o_ref):
    """One grid step = one block of batch elements, resident in VMEM.

    x_ref   : (Bblk, C, S) f32  input block (S = H*W padded to 128 lanes)
    w_ref   : (O, C)       f32  stacked [Wq; Wk; Wv], sections padded to x8 rows
    b_ref   : (O, 1)       f32  stacked biases (same row padding)
    corr_ref: (Crp, Crp)   f32  exact logits correction (spatial-pad rank-1 term
                                + large positive mask for padded k rows)
    o_ref   : (Bblk, C, S) f32  output block
    """
    bblk, c, _ = x_ref.shape
    crp = corr_ref.shape[0]

    # Loop-invariant operands: load once per grid step, stay resident.
    w = w_ref[...]
    bias = b_ref[...]
    corr = corr_ref[...]

    def compute_one(b):
        xb = x_ref[b]                                                  # (C, S)
        # Fused q/k/v projection: single 2-D MXU matmul, no broadcast of W.
        qkv = jnp.dot(w, xb, preferred_element_type=jnp.float32) + bias  # (O, S)
        # Sublane-tile-aligned section views (crp is a multiple of 8).
        q = qkv[:crp]                                                  # (Crp, S)
        k = qkv[crp:2 * crp]                                           # (Crp, S)
        v = qkv[2 * crp:]                                              # (Cp,  S)

        # Channel-wise logits: contract the spatial (lane) axis of q and k
        # directly (A @ B^T -> transposed MXU weight load, no XLU transpose).
        logits = lax.dot_general(q, k, (((1,), (1,)), ((), ())),
                                 preferred_element_type=jnp.float32)   # (Crp, Crp)
        logits = logits - corr

        m = jnp.max(logits, axis=-1, keepdims=True)
        p = jnp.exp(logits - m)
        denom = jnp.sum(p, axis=-1, keepdims=True)
        attn = p / denom                       # exact divide (hidden under DMA)

        out = jnp.dot(attn[:c], v, preferred_element_type=jnp.float32)  # (C, S)
        o_ref[b] = (out + xb).astype(o_ref.dtype)

    if bblk == 1:
        compute_one(0)
    else:
        # fori_loop (not an unrolled Python loop) bounds the live range of the
        # per-batch intermediates, so VMEM pressure is independent of Bblk.
        def body(b, carry):
            compute_one(b)
            return carry

        lax.fori_loop(0, bblk, body, 0)


def _round_up(x, m):
    return ((x + m - 1) // m) * m


def _vmem_budget():
    """(block-picking budget, scoped-VMEM limit) in bytes, generation aware."""
    try:
        cap = int(pltpu.get_tpu_info().vmem_capacity_bytes)
    except Exception:
        cap = 64 << 20                        # conservative (v7x-class) fallback
    if cap <= (64 << 20):                     # v7x: 64 MiB per TensorCore
        budget = min(int(0.60 * cap), 44 << 20)
        limit = min(int(0.80 * cap), 52 << 20)
    else:                                     # v5e / v6e: 128 MiB
        budget = int(0.60 * cap)
        limit = int(0.80 * cap)
    return budget, limit


def _pick_bblk(batch, c, hw_pad, o_rows, budget_bytes):
    """Largest batch block fitting the VMEM budget while keeping >= 2 grid
    steps (v7x dual-TensorCore sharding + DMA/compute pipeline overlap)."""
    min_steps = 2 if batch >= 2 else 1
    max_bblk = max(1, -(-batch // min_steps))
    per_bb = 4 * c * hw_pad * 4                    # x + out blocks, double-buffered
    itm = 3 * o_rows * hw_pad * 4                  # qkv + q/k/v/attn temporaries
    fixed = 2 * o_rows * (c + 1) * 4 + (1 << 20)   # weights / bias / corr + slack
    avail = budget_bytes - itm - fixed
    best = int(max(1, min(max_bblk, avail // per_bb)))
    # Balance the tail block (same number of steps, more even block sizes).
    steps = -(-batch // best)
    return -(-batch // steps)


def channelwise_self_attention(x_nchw, wq, bq, wk, bk, wv, bv):
    """x_nchw: (B, C, H, W) float32; w*/b* are the squeezed 1x1-conv params."""
    B, C, H, W = x_nchw.shape
    Cr = wq.shape[0]
    if Cr != C:
        # The PyTorch module's second bmm is only shape-consistent for
        # reduction == 1 (Cr == C); mirror that constraint here.
        raise ValueError(f"reduction must be 1 (got Cr={Cr}, C={C})")

    HW = H * W
    HW_pad = _round_up(HW, 128)                    # lane-dense spatial slab
    Crp = _round_up(Cr, 8)                         # f32 sublane tile
    Cp = _round_up(C, 8)
    O = 2 * Crp + Cp

    x = x_nchw.astype(jnp.float32).reshape(B, C, HW)
    if HW_pad != HW:
        x = jnp.pad(x, ((0, 0), (0, 0), (0, HW_pad - HW)))

    def pad_rows(a, rows):
        return jnp.pad(a, ((0, rows - a.shape[0]),) + ((0, 0),) * (a.ndim - 1))

    wq_p, wk_p, wv_p = pad_rows(wq, Crp), pad_rows(wk, Crp), pad_rows(wv, Cp)
    bq_p, bk_p, bv_p = pad_rows(bq, Crp), pad_rows(bk, Crp), pad_rows(bv, Cp)
    w_qkv = jnp.concatenate([wq_p, wk_p, wv_p], axis=0).astype(jnp.float32)   # (O, C)
    b_qkv = jnp.concatenate([bq_p, bk_p, bv_p], axis=0).reshape(O, 1).astype(jnp.float32)

    # Exact logits correction (see header comment).
    corr = float(HW_pad - HW) * jnp.outer(bq_p, bk_p)                         # (Crp, Crp)
    if Crp != Cr:
        col = jnp.arange(Crp)
        corr = corr + jnp.where(col[None, :] >= Cr, 1e30, 0.0)
    corr = corr.astype(jnp.float32)

    budget, vmem_limit = _vmem_budget()
    Bblk = _pick_bblk(B, C, HW_pad, O, budget)
    grid = (pl.cdiv(B, Bblk),)
    # TODO(synk): for very large C*H*W where even Bblk == 1 exceeds the budget
    # (mainly v7x's 64 MiB VMEM), add a second "arbitrary" grid axis over
    # HW_pad chunks with a (Crp, Crp) logits accumulator (pl.when init/finalize)
    # and a second streaming pass for attn @ v.

    out = pl.pallas_call(
        _cwsa_kernel,
        out_shape=jax.ShapeDtypeStruct((B, C, HW_pad), jnp.float32),
        grid_spec=pltpu.PrefetchScalarGridSpec(
            num_scalar_prefetch=0,
            grid=grid,
            in_specs=[
                pl.BlockSpec((Bblk, C, HW_pad), lambda i: (i, 0, 0)),   # x
                pl.BlockSpec((O, C), lambda i: (0, 0)),                 # W_qkv
                pl.BlockSpec((O, 1), lambda i: (0, 0)),                 # b_qkv
                pl.BlockSpec((Crp, Crp), lambda i: (0, 0)),             # corr
            ],
            out_specs=pl.BlockSpec((Bblk, C, HW_pad), lambda i: (i, 0, 0)),
        ),
        compiler_params=pltpu.CompilerParams(
            dimension_semantics=("parallel",),
            vmem_limit_bytes=int(vmem_limit)),
    )(x, w_qkv, b_qkv, corr)

    if HW_pad != HW:
        out = out[:, :, :HW]
    return out.reshape(B, C, H, W)


def _reference(x_nchw, wq, bq, wk, bk, wv, bv):
    """Plain-JAX mirror of the PyTorch forward, for correctness checking."""
    B, C, H, W = x_nchw.shape
    hp = jax.lax.Precision.HIGHEST
    x = x_nchw.reshape(B, C, H * W)
    q = jnp.einsum("oc,bcs->bos", wq, x, precision=hp) + bq[None, :, None]
    k = jnp.einsum("oc,bcs->bos", wk, x, precision=hp) + bk[None, :, None]
    v = jnp.einsum("oc,bcs->bos", wv, x, precision=hp) + bv[None, :, None]
    attn = jnp.einsum("bis,bjs->bij", q, k, precision=hp)
    attn = jax.nn.softmax(attn, axis=-1)
    out = jnp.einsum("bij,bjs->bis", attn, v, precision=hp) + x
    return out.reshape(B, C, H, W)


if __name__ == "__main__":
    B, C, H, W = 2, 4, 16, 16
    reduction = 1
    Cr = C // reduction

    key = jax.random.PRNGKey(0)
    kx, kwq, kbq, kwk, kbk, kwv, kbv = jax.random.split(key, 7)

    x = jax.random.normal(kx, (B, C, H, W), dtype=jnp.float32)
    # Deterministic synthetic parameters (Conv2d 1x1 weights squeezed to 2-D).
    wq = 0.2 * jax.random.normal(kwq, (Cr, C), dtype=jnp.float32)
    bq = 0.1 * jax.random.normal(kbq, (Cr,), dtype=jnp.float32)
    wk = 0.2 * jax.random.normal(kwk, (Cr, C), dtype=jnp.float32)
    bk = 0.1 * jax.random.normal(kbk, (Cr,), dtype=jnp.float32)
    wv = 0.2 * jax.random.normal(kwv, (C, C), dtype=jnp.float32)
    bv = 0.1 * jax.random.normal(kbv, (C,), dtype=jnp.float32)

    out = channelwise_self_attention(x, wq, bq, wk, bk, wv, bv)
    out = jax.block_until_ready(out)

    ref = _reference(x, wq, bq, wk, bk, wv, bv)
    assert out.shape == (B, C, H, W)
    assert jnp.allclose(out, ref, atol=1e-3, rtol=1e-3), "mismatch vs reference"

    print("KERNEL_OK")
</pallas_src>

<mosaic_0001>
module attributes {stable_mosaic.version = 11 : i64} {
  func.func @_cwsa_kernel(%arg0: i32, %arg1: memref<1x4x256xf32, #tpu.memory_space<vmem>>, %arg2: memref<24x4xf32, #tpu.memory_space<vmem>>, %arg3: memref<24x1xf32, #tpu.memory_space<vmem>>, %arg4: memref<8x8xf32, #tpu.memory_space<vmem>>, %arg5: memref<1x4x256xf32, #tpu.memory_space<vmem>>) attributes {dimension_semantics = [#tpu.dimension_semantics<parallel>], iteration_bounds = array<i64: 2>, scalar_prefetch = 0 : i64, scratch_operands = 0 : i64, tpu.core_type = #tpu.core_type<tc>, window_params = [{transform_indices = @transform_0, window_bounds = array<i64: 1, 4, 256>}, {pipeline_mode = #tpu.pipeline_mode<synchronous>, transform_indices = @transform_1, window_bounds = array<i64: 24, 4>}, {pipeline_mode = #tpu.pipeline_mode<synchronous>, transform_indices = @transform_2, window_bounds = array<i64: 24, 1>}, {pipeline_mode = #tpu.pipeline_mode<synchronous>, transform_indices = @transform_3, window_bounds = array<i64: 8, 8>}, {transform_indices = @transform_4, window_bounds = array<i64: 1, 4, 256>}]} {
    %c0 = arith.constant 0 : index
    %c0_0 = arith.constant 0 : index
    %0 = vector.load %arg2[%c0, %c0_0] : memref<24x4xf32, #tpu.memory_space<vmem>>, vector<24x4xf32>
    %c0_1 = arith.constant 0 : index
    %c0_2 = arith.constant 0 : index
    %1 = vector.load %arg3[%c0_1, %c0_2] : memref<24x1xf32, #tpu.memory_space<vmem>>, vector<24x1xf32>
    %c0_3 = arith.constant 0 : index
    %c0_4 = arith.constant 0 : index
    %2 = vector.load %arg4[%c0_3, %c0_4] : memref<8x8xf32, #tpu.memory_space<vmem>>, vector<8x8xf32>
    %c0_5 = arith.constant 0 : index
    %c0_6 = arith.constant 0 : index
    %c0_7 = arith.constant 0 : index
    %3 = vector.load %arg1[%c0_5, %c0_6, %c0_7] : memref<1x4x256xf32, #tpu.memory_space<vmem>>, vector<1x4x256xf32>
    %4 = vector.shape_cast %3 : vector<1x4x256xf32> to vector<4x256xf32>
    %cst = arith.constant dense<0.000000e+00> : vector<24x256xf32>
    %5 = tpu.matmul %0, %4, %cst {dimension_numbers = #tpu.dot_dimension_numbers<[1], [0], [0], [1], [0, 0, 1, 1], [], []>} : vector<24x4xf32>, vector<4x256xf32>, vector<24x256xf32> -> vector<24x256xf32>
    %6 = vector.broadcast %1 : vector<24x1xf32> to vector<24x256xf32>
    %7 = arith.addf %5, %6 : vector<24x256xf32>
    %8 = vector.extract_strided_slice %7 {offsets = [0, 0], sizes = [8, 256], strides = [1, 1]} : vector<24x256xf32> to vector<8x256xf32>
    %9 = vector.extract_strided_slice %7 {offsets = [8, 0], sizes = [8, 256], strides = [1, 1]} : vector<24x256xf32> to vector<8x256xf32>
    %10 = vector.extract_strided_slice %7 {offsets = [16, 0], sizes = [8, 256], strides = [1, 1]} : vector<24x256xf32> to vector<8x256xf32>
    %cst_8 = arith.constant dense<0.000000e+00> : vector<8x8xf32>
    %11 = tpu.matmul %8, %9, %cst_8 {dimension_numbers = #tpu.dot_dimension_numbers<[1], [1], [0], [0], [0, 0, 1, 0], [], []>} : vector<8x256xf32>, vector<8x256xf32>, vector<8x8xf32> -> vector<8x8xf32>
    %12 = arith.subf %11, %2 : vector<8x8xf32>
    %cst_9 = arith.constant dense<0xFF800000> : vector<8xf32>
    %13 = vector.multi_reduction <maximumf>, %12, %cst_9 [1] : vector<8x8xf32> to vector<8xf32>
    %14 = vector.shape_cast %13 : vector<8xf32> to vector<8x1xf32>
    %15 = vector.broadcast %14 : vector<8x1xf32> to vector<8x8xf32>
    %16 = arith.subf %12, %15 : vector<8x8xf32>
    %17 = math.exp %16 : vector<8x8xf32>
    %cst_10 = arith.constant dense<0.000000e+00> : vector<8xf32>
    %18 = vector.multi_reduction <add>, %17, %cst_10 [1] : vector<8x8xf32> to vector<8xf32>
    %19 = vector.shape_cast %18 : vector<8xf32> to vector<8x1xf32>
    %20 = vector.broadcast %19 : vector<8x1xf32> to vector<8x8xf32>
    %21 = arith.divf %17, %20 : vector<8x8xf32>
    %22 = vector.extract_strided_slice %21 {offsets = [0, 0], sizes = [4, 8], strides = [1, 1]} : vector<8x8xf32> to vector<4x8xf32>
    %cst_11 = arith.constant dense<0.000000e+00> : vector<4x256xf32>
    %23 = tpu.matmul %22, %10, %cst_11 {dimension_numbers = #tpu.dot_dimension_numbers<[1], [0], [0], [1], [0, 0, 1, 1], [], []>} : vector<4x8xf32>, vector<8x256xf32>, vector<4x256xf32> -> vector<4x256xf32>
    %24 = arith.addf %23, %4 : vector<4x256xf32>
    %c0_12 = arith.constant 0 : index
    %c0_13 = arith.constant 0 : index
    %c0_14 = arith.constant 0 : index
    %25 = vector.load %arg5[%c0_12, %c0_13, %c0_14] : memref<1x4x256xf32, #tpu.memory_space<vmem>>, vector<1x4x256xf32>
    %26 = vector.shape_cast %25 : vector<1x4x256xf32> to vector<4x256xf32>
    %27 = vector.shape_cast %24 : vector<4x256xf32> to vector<1x4x256xf32>
    tpu.vector_store %arg5[%c0_12, %c0_13, %c0_14], %27 {strides = array<i32>} : memref<1x4x256xf32, #tpu.memory_space<vmem>>, vector<1x4x256xf32>,
    return
  }
  func.func @transform_0(%arg0: i32) -> (i32, i32, i32) {
    %c0_i32 = arith.constant 0 : i32
    %c0_i32_0 = arith.constant 0 : i32
    %c0_i32_1 = arith.constant 0 : i32
    return %arg0, %c0_i32, %c0_i32_0 : i32, i32, i32
  }
  func.func @transform_1(%arg0: i32) -> (i32, i32) {
    %c0_i32 = arith.constant 0 : i32
    %c0_i32_0 = arith.constant 0 : i32
    %c0_i32_1 = arith.constant 0 : i32
    return %c0_i32, %c0_i32_0 : i32, i32
  }
  func.func @transform_2(%arg0: i32) -> (i32, i32) {
    %c0_i32 = arith.constant 0 : i32
    %c0_i32_0 = arith.constant 0 : i32
    %c0_i32_1 = arith.constant 0 : i32
    return %c0_i32, %c0_i32_0 : i32, i32
  }
  func.func @transform_3(%arg0: i32) -> (i32, i32) {
    %c0_i32 = arith.constant 0 : i32
    %c0_i32_0 = arith.constant 0 : i32
    %c0_i32_1 = arith.constant 0 : i32
    return %c0_i32, %c0_i32_0 : i32, i32
  }
  func.func @transform_4(%arg0: i32) -> (i32, i32, i32) {
    %c0_i32 = arith.constant 0 : i32
    %c0_i32_0 = arith.constant 0 : i32
    %c0_i32_1 = arith.constant 0 : i32
    return %arg0, %c0_i32, %c0_i32_0 : i32, i32, i32
  }
}

</mosaic_0001>

<bundles_post_ra>
// kernel: tpu_custom_call.1
= control target key start
LH: loop header
LB: loop body
LE: loop exit
PB: predicated region body
PF: predicated region fallthrough
CT: control target
= control target key end

     0   :  { %9 = vsyncpa [#allocation3], 0  ;;  %s843_s0 = inlined_call_operand.vmem [shape: f32[2,4,256], index: 0, kind: input, shape index: {}]   ;;  %s844_s1 = inlined_call_operand.vmem [shape: f32[24,4], index: 1, kind: input, shape index: {}]   ;;  %s845_s2 = inlined_call_operand.vmem [shape: f32[24,1], index: 2, kind: input, shape index: {}]   ;;  %s846_s3 = inlined_call_operand.vmem [shape: f32[8,8], index: 3, kind: input, shape index: {}]   ;;  %s847_s4 = inlined_call_operand.hbm [shape: f32[2,4,256], index: 4, kind: output, shape index: {}]  }
   0x1   :  { %11 = vsyncpa [#allocation3 + $0x1], 0  ;;  %s715_s15 = smov 0   ;;  %s717_s16 = smov 0  }
   0x2   :  { %s719_s17 = smov 0   ;;  %s721_s18 = smov 0  }
   0x3 LB: > { %s736_s19 = sadd.s32 4294967295, %s685_s18   ;;  %s556_s20 = sadd.s32 4294967294, %s685_s18   ;;  %s685_s18 = sphi %s721_s18, %s853_s18   ;;  %s681_s17 = sphi %s719_s17, %s852_s17   ;;  %s677_s16 = sphi %s717_s16, %s851_s16   ;;  %s673_s15 = sphi %s715_s15, %s850_s15  }
   0x4   : > { %s740_s21 = sadd.s32 1, %s685_s18   ;;  %s113_s22 = sadd.s32 1, %s681_s17 }
   0x5   : > { %s110_s23 = ssub.s32 %s685_s18, %s740_s21  ;;  %p123_p0 = scmp.ne.s32.totalorder %s681_s17, %s677_s16 }
   0x6   : > { %p111_p1 = scmp.eq.s32.totalorder %s110_s23, 0  ;;  %p124_p2 = scmp.eq.s32.totalorder %s736_s19, 1 }
   0x7   : > { %p129_p3 = scmp.ne.s32.totalorder %s677_s16, %s673_s15  ;;  %p130_p4 = scmp.eq.s32.totalorder %s556_s20, 1 }
   0x8   : > { %s751_s24 = scalar_select %p111_p1, %s681_s17, %s113_s22  }
   0x9   : > { %p753_p5 = por %p124_p2, %p123_p0  ;;  %p757_p6 = por %p130_p4, %p129_p3 }
   0xa   : > { %p559_p7 = scmp.ge.s32.totalorder %s685_s18, 1  ;;  %p165_p8 = scmp.lt.s32.totalorder %s685_s18, 3 }
   0xc   : > { %p166_p9 = pnand %p559_p7, %p165_p8 }
   0xd   : > { %p191_p10 = scmp.lt.s32.totalorder (!%p166_p9), %s736_s19, 1  ;;  %v687_v0 = vmov (!%p166_p9), 0.0   ;;  %v200_v1 = vld [vmem:[%s845_s2 + $0x8] sm:$0xff] (!%p166_p9)  ;;  %v688_v2 = vmov (!%p166_p9), 0   ;;  %v199_v3 = vld [vmem:[%s845_s2] sm:$0xff] (!%p166_p9)  ;;  %vm231_vm0 = vcmask (!%p166_p9), 1043456  }
   0xe   : > { %169 = sbr.rel (%p166_p9) target bundleno = 1012 (0x3f4), region = 36  ;;  %300 = vmatprep.mubr.f32.mxu0 (!%p166_p9), %v687_v0  ;;  %617 = vset.pattern.permute.xlu0 (!%p166_p9), %v688_v2  ;;  %v196_v6 = vld [vmem:[%s844_s1] sm:$0xff] (!%p166_p9)  ;;  %vm221_vm1 = vcmask (!%p166_p9), 31744   ;;  %v201_v7 = vld [vmem:[%s845_s2 + $0x10] sm:$0xff] (!%p166_p9)  ;;  %v197_v8 = vld [vmem:[%s844_s1 + $0x8] sm:$0xff] (!%p166_p9)  ;;  %vm390_vm2 = vcmask (!%p166_p9), 64512  }
   0xf   : > { %211 = vperm.xlu0 (!%p166_p9), %617, %v200_v1   ;;  %v198_v9 = vld [vmem:[%s844_s1 + $0x10] sm:$0xff] (!%p166_p9)  ;;  %v202_v25 = vld [vmem:[%s846_s3] sm:$0xff] (!%p166_p9)  ;;  %s575_s5 = sshll.u32 (!%p166_p9), %s736_s19, 7 }
  0x10   : > { %s801_s10 = scalar_lea.hbm (!%p166_p9), %s847_s4, %s575_s5 }
  0x13   : > { %206 = vperm.xlu0 (!%p166_p9), %617, %v199_v3  }
  0x15   : > { %s192_s29 = scalar_select %p191_p10, %s736_s19, 1 }
  0x16   : > { %s689_s19 = smov [#allocation2]  }
  0x17   : > { %s574_s30 = sshll.u32 %s192_s29, 3  ;;  %216 = vperm.xlu0 %617, %v201_v7   ;;  %s188_s29 = sand.u32 1, %s677_s16  }
  0x18   : > { %s195_s9 = scalar_lea.vmem %s843_s0, %s574_s30  ;;  %s560_s30 = sshll.u32 %s188_s29, 3 }
  0x19   : > { %v203_v4 = vld [vmem:[%s195_s9] sm:$0xff]  ;;  %s190_s6 = scalar_lea.vmem [#allocation2], %s560_s30  ;;  %s483_s11 = scalar_lea.sflag [#allocation3], %s188_s29 }
  0x1a   : > { %v774_v5 = vcombine.high %v203_v4, %v203_v4  ;;  %s497_s7 = sshll.u32 %s190_s6, 4  ;;  %s627_s13 = sshll.u32 %s689_s19, 4  ;;  %s803_s7 = int_to_ptr.vmem [resolvable:$true] %s497_s7  ;;  %s628_s13 = int_to_ptr.vmem [resolvable:$false] %s627_s13 }
  0x1b   : > { %s623_s12 = scalar_lea.vmem %s803_s7, 128  ;;  %s629_s14 = scalar_lea.vmem %s628_s13, 256 }
  0x1c   : > { %563 = vmatprep.subr.msk.mxu0 %vm231_vm0, %v774_v5  ;;  %p624_p11 = scmp.ne.s32.totalorder %s803_s7, %s623_s12  ;;  %p630_p0 = scmp.lt.s32.totalorder %s803_s7, %s628_s13 }
  0x1d   : > { %564 = vmatpush1.msk.msra.mxu0 %vm231_vm0, %v203_v4  ;;  %p631_p1 = scmp.lt.s32.totalorder %s629_s14, %s623_s12 }
  0x1e   : > { %565 = vmatmul.mubr.msk.f32.vlgmr.msra.gmra.mrb[0].mxu0 %vm221_vm1, %v196_v6  ;;  %p625_p12 = pnand %p624_p11, %p753_p5 }
  0x1f   : > { %306 = vmatprep.mubr.f32.mxu0 %v687_v0  ;;  %p632_p2 = por %p631_p1, %p630_p0 }
  0x20   : > { %p626_p13 = pneg %p625_p12 }
  0x22   : > { %566 = vmatmul.mubr.msk.f32.gmra.mrb[2].mxu0 %vm221_vm1, %v197_v8  ;;  %p633_p3 = pnand %p632_p2, %p626_p13 }
  0x23   : > { %312 = vmatprep.mubr.f32.mxu0 %v687_v0 }
  0x26   : > { %567 = vmatmul.mubr.msk.f32.gmra.mrb[4].mxu0 %vm221_vm1, %v198_v9 }
  0x8e   : > { %v212_v10 = vpop.permute.xlu0 %211 }
  0x92   : > { %v207_v11 = vpop.permute.xlu0 %206 }
  0x96   : > { %v217_v20 = vpop.permute.xlu0 %216 }
  0xf1   : > { %v302_v12 = vpop.f32.mrb[0].mxu0 }
  0xf2   : > { %v304_v13 = vpop.f32.mrb[1].mxu0  ;;  %v303_v22 = vadd.f32 %v302_v12, %v207_v11 }
  0xf3   : > { %v305_v14 = vadd.f32 %v304_v13, %v207_v11 }
  0xf5   : > { %v308_v15 = vpop.f32.mrb[2].mxu0  ;;  %383 = vmatprep.mubr.f32.mxu1 %v305_v14 }
  0xf6   : > { %v310_v16 = vpop.f32.mrb[3].mxu0  ;;  %v309_v18 = vadd.f32 %v308_v15, %v212_v10 }
  0xf7   : > { %v311_v17 = vadd.f32 %v310_v16, %v212_v10 }
  0xf9   : > { %v314_v19 = vpop.f32.mrb[4].mxu0  ;;  %319 = vmatprep.subr.mxu1 %v311_v17 }
  0xfa   : > { %v316_v21 = vpop.f32.mrb[5].mxu0  ;;  %320 = vmatpush1.xpose.msra.mxu1 %v309_v18  ;;  %v315_v24 = vadd.f32 %v314_v19, %v217_v20 }
  0xfb   : > { %v317_v23 = vadd.f32 %v316_v21, %v217_v20 }
  0xfd   : > { %384 = vmatmul.mubr.f32.vlgmr.msra.gmra.mrb[0].mxu1 %v303_v22  ;;  %406 = vmatprep.subr.mxu1 %v317_v23 }
  0xfe   : > { %407 = vmatpush1.msra.mxu1 %v315_v24  ;;  %470 = vmatprep.mubr.f32.mxu1 %v687_v0 }
 0x1d0   : > { %v385_v26 = vpop.f32.mrb[0].mxu1 }
 0x1d1   : > { %v389_v27 = vsub.f32 %v385_v26, %v202_v25  ;;  %v387_v28 = vpop.f32.mrb[1].mxu1 }
 0x1d3   : > { %v391_v29 = vsel %vm390_vm2, %v389_v27, -inf }
 0x1d4   : > { %392 = vmax.xlane.f32.xlu1 %v391_v29 }
 0x261   : > { %v393_v30 = vpop.xlane.xlu1 %392 }
 0x262   : > { %v394_v31 = vsub.f32 %v389_v27, %v393_v30 }
 0x264   : > { %v395_v32 = vmul.f32 1.442695, %v394_v31 }
 0x266   : > { %619 = vpow2.f32 %v395_v32 }
 0x270   : > { %v620_v33 = vpop.eup %619 }
 0x271   : > { %v397_v34 = vsel %vm390_vm2, %v620_v33, 0.0 }
 0x272   : > { %398 = vadd.xlane.f32.xlu1 %v397_v34 }
 0x2ff   : > { %v399_v35 = vpop.xlane.xlu1 %398 }
 0x300   : > { %621 = vrcp.f32 %v399_v35 }
 0x30a   : > { %v622_v36 = vpop.eup %621 }
 0x30b   : > { %v401_v37 = vmul.f32 %v622_v36, %v620_v33 }
 0x30d   : > { %568 = vmatmul.mubr.msk.f32.vlgmr.msra.gmra.mrb[2].mxu1 %vm390_vm2, %v401_v37 }
 0x3e0   : > { %v472_v38 = vpop.f32.mrb[2].mxu1 }
 0x3e1   : > { %v473_v39 = vadd.f32 %v472_v38, %v203_v4  ;;  %v474_v40 = vpop.f32.mrb[3].mxu1 }
 0x3e2   : > { %v475_v41 = vadd.f32 %v474_v40, %v774_v5 }
 0x3e4   : > { %v479_v42 = vcombine.low %v473_v39, %v475_v41 }
 0x3e6   : > { %481 = vst [vmem:[%s190_s6] sm:$0xff] %v479_v42 }
 0x3e7   : > { %636 = shalt.err (!%p633_p3)
}
 0x3e8   : > { %s637_s20 = scalar_lea.hbm %s801_s10, 128  ;;  %s641_s27 = scalar_lea.hbm %s847_s4, 256 }
 0x3e9   : > { %p638_p4 = scmp.ne.s32.totalorder %s801_s10, %s637_s20  ;;  %p642_p9 = scmp.lt.u32.totalorder %s801_s10, %s847_s4 }
 0x3ea   : > { %p643_p10 = scmp.lt.u32.totalorder %s641_s27, %s637_s20  ;;  %p645_p12 = scmp.lt.u32.totalorder %s637_s20, %s801_s10 }
 0x3eb   : > { %p639_p7 = pnand %p638_p4, %p753_p5 }
 0x3ec   : > { %p644_p11 = por %p643_p10, %p642_p9 }
 0x3ed   : > { %p640_p8 = pneg %p639_p7 }
 0x3ee   : > { %p646_p13 = por %p645_p12, %p644_p11 }
 0x3f0   : > { %p647_p0 = pnand %p646_p13, %p640_p8 }
 0x3f2   : > { %650 = shalt.err (!%p647_p0)
}
 0x3f3   : > { %576 = dma.vmem_to_hbm [thread:$0]  (%p753_p5), %s803_s7, 128, %s801_s10, %s483_s11  }
 0x3f4 PF: > { %p582_p1 = scmp.ge.s32.totalorder %s685_s18, 2  ;;  %s509_s30 = sand.u32 1, %s673_s15  }
 0x3f5   : > { %s510_s5 = scalar_lea.sflag [#allocation3], %s509_s30 }
 0x3f6   : > { %p579_p2 = pnand %p582_p1, %p757_p6 }
 0x3f8   : > { %668 = dma.done.wait (!%p579_p2), %s510_s5, 128  }
 0x3f9   : > { %670 = vsyncadd (!%p579_p2), %s510_s5, 4294967168  ;;  %p14_p3 = scmp.ge.s32.totalorder %s740_s21, 4   ;;  %s850_s15 = smov %s677_s16 }
 0x3fa   : > { %s851_s16 = smov %s681_s17  ;;  %s852_s17 = smov %s751_s24 }
 0x3fb   : > { %s853_s18 = smov %s740_s21  ;;  %16 = sbr.rel (!%p14_p3) target bundleno = 3 (0x3), region = 71 }
 0x402   :  { %515 = vsyncpa [#allocation3], 1 }
 0x403   :  { %517 = vsyncpa [#allocation3 + $0x1], 1 }

</bundles_post_ra>
